<compile_context>
chip_gen: v7x
topology: tpu7x:2x2x1
jax: 0.10.0
libtpu: 0.0.40
codegen_flags: <defaults>
</compile_context>

<pallas_src>
import math

import jax
import jax.numpy as jnp
from jax import lax
from jax.experimental import pallas as pl
from jax.experimental.pallas import tpu as pltpu


_NEG_BIG = -1e30  # finite "minus infinity" used for padded key columns


def _flash_attn_kernel(q_ref, k_ref, v_ref, m_ref, o_ref, m_sc, l_sc, acc_sc):
    kv = pl.program_id(3)

    @pl.when(kv == 0)
    def _init():
        m_sc[...] = jnp.full_like(m_sc, -jnp.inf)
        l_sc[...] = jnp.zeros_like(l_sc)
        acc_sc[...] = jnp.zeros_like(acc_sc)

    q = q_ref[...]                               # (tq, D)  input dtype (f32)
    k = k_ref[...]                               # (tk, D)  bf16
    v = v_ref[...]                               # (tk, D)  bf16
    mask = m_ref[...].astype(jnp.float32)        # (tq, tk) bf16 -> f32

    # Fold 1/sqrt(d) into the small (tq, D) Q tile (f32), then cast once to
    # bf16 so the MXU runs its native bf16 path with f32 accumulation.
    scale = 1.0 / math.sqrt(q.shape[-1])
    qs = (q.astype(jnp.float32) * scale).astype(jnp.bfloat16)

    # q @ k^T without materializing the transpose: contract last dims of both.
    s = lax.dot_general(
        qs, k,
        dimension_numbers=(((1,), (1,)), ((), ())),
        preferred_element_type=jnp.float32,
    ) + mask                                     # (tq, tk) f32

    # Online (streaming) softmax update — state and elementwise math in f32.
    m_prev = m_sc[...]
    m_new = jnp.maximum(m_prev, jnp.max(s, axis=-1, keepdims=True))
    alpha = jnp.exp(m_prev - m_new)
    p = jnp.exp(s - m_new)                       # (tq, tk) f32
    l_sc[...] = alpha * l_sc[...] + jnp.sum(p, axis=-1, keepdims=True)
    acc_sc[...] = alpha * acc_sc[...] + lax.dot_general(
        p.astype(jnp.bfloat16), v,               # bf16 x bf16 -> f32 acc (MXU native)
        dimension_numbers=(((1,), (0,)), ((), ())),
        preferred_element_type=jnp.float32,
    )
    m_sc[...] = m_new

    @pl.when(kv == pl.num_programs(3) - 1)
    def _finalize():
        inv_l = pl.reciprocal(l_sc[...], approx=True)   # EUP slot, ~free
        o_ref[...] = (acc_sc[...] * inv_l).astype(o_ref.dtype)


# Tile candidates: bias the Q tile up (cuts K/V HBM re-reads), keep K tiles
# moderate so (tq, tk) intermediates / mask buffers stay well inside VMEM.
_TQ_CANDS = (1024, 768, 512, 384, 256, 128)
_TK_CANDS = (512, 384, 256, 128)
_MAX_FULL_EXTENT = 256  # largest awkward extent we take as one full block


def _pick_tile(s, candidates):
    """Return (tile, padded_extent) for a sequence axis of length s."""
    for c in candidates:
        if s % c == 0:
            return c, s
    if s <= _MAX_FULL_EXTENT:
        # Small awkward extent: one full-size block (allowed regardless of 8/128).
        return s, s
    # Large awkward extent: bounded tile + padding (keeps VMEM in check).
    t = candidates[-1]
    padded = ((s + t - 1) // t) * t
    return t, padded


def attention(q, k0, v, m0):
    B, H, Sq, D = q.shape
    Sk = k0.shape[2]
    assert k0.shape == (B, H, Sk, D)
    assert v.shape == (B, H, Sk, D)
    assert m0.shape == (B, H, Sq, Sk)

    tq, Sq_p = _pick_tile(Sq, _TQ_CANDS)
    tk, Sk_p = _pick_tile(Sk, _TK_CANDS)

    # v7x has two TensorCores: make sure the "parallel" grid extent is >= 2
    # when possible so neither core sits idle.
    if B * H * (Sq_p // tq) < 2:
        half = tq // 2
        if half >= 8 and half % 8 == 0 and Sq_p % half == 0:
            tq = half

    pad_q = Sq_p - Sq
    pad_k = Sk_p - Sk
    if pad_q or pad_k:
        q = jnp.pad(q, ((0, 0), (0, 0), (0, pad_q), (0, 0)))
        k0 = jnp.pad(k0, ((0, 0), (0, 0), (0, pad_k), (0, 0)))
        v = jnp.pad(v, ((0, 0), (0, 0), (0, pad_k), (0, 0)))
        # Padded key columns get a huge negative bias -> zero softmax weight.
        m0 = jnp.pad(m0, ((0, 0), (0, 0), (0, pad_q), (0, pad_k)),
                     constant_values=_NEG_BIG)

    # Halve the dominant HBM streams: mask / K / V travel as bf16.  (In a real
    # model these casts fuse into the producers of k0/v/m0.)
    k_b = k0.astype(jnp.bfloat16)
    v_b = v.astype(jnp.bfloat16)
    m_b = m0.astype(jnp.bfloat16)

    n_q = Sq_p // tq
    n_k = Sk_p // tk
    grid = (B, H, n_q, n_k)

    # Leading (b, h) block dims are squeezed (None) so the kernel sees 2-D tiles.
    q_spec = pl.BlockSpec((None, None, tq, D), lambda b, h, qi, ki: (b, h, qi, 0))
    k_spec = pl.BlockSpec((None, None, tk, D), lambda b, h, qi, ki: (b, h, ki, 0))
    v_spec = pl.BlockSpec((None, None, tk, D), lambda b, h, qi, ki: (b, h, ki, 0))
    m_spec = pl.BlockSpec((None, None, tq, tk), lambda b, h, qi, ki: (b, h, qi, ki))
    o_spec = pl.BlockSpec((None, None, tq, D), lambda b, h, qi, ki: (b, h, qi, 0))

    out = pl.pallas_call(
        _flash_attn_kernel,
        out_shape=jax.ShapeDtypeStruct((B, H, Sq_p, D), q.dtype),
        grid_spec=pltpu.PrefetchScalarGridSpec(
            num_scalar_prefetch=0,
            grid=grid,
            in_specs=[q_spec, k_spec, v_spec, m_spec],
            out_specs=o_spec,
            scratch_shapes=[
                pltpu.VMEM((tq, 1), jnp.float32),   # running row max
                pltpu.VMEM((tq, 1), jnp.float32),   # running row sum
                pltpu.VMEM((tq, D), jnp.float32),   # output accumulator
            ],
        ),
        compiler_params=pltpu.CompilerParams(
            dimension_semantics=("parallel", "parallel", "parallel", "arbitrary"),
            # Covers the 16 MiB v5e scoped default at the largest tile configs
            # while leaving plenty of headroom on v7x's 64 MiB physical VMEM.
            vmem_limit_bytes=40 * 1024 * 1024,
        ),
    )(q, k_b, v_b, m_b)

    if pad_q:
        out = out[:, :, :Sq, :]
    return out


def _reference(q, k0, v, m0):
    d = q.shape[-1]
    qk = jnp.einsum("bhqd,bhkd->bhqk", q, k0) / math.sqrt(d)
    qk = qk + m0
    w = jax.nn.softmax(qk, axis=-1)
    return jnp.einsum("bhqk,bhkd->bhqd", w, v)


def _check(B, H, S, D, key):
    kq, kk, kv, km = jax.random.split(key, 4)
    q = jax.random.normal(kq, (B, H, S, D), dtype=jnp.float32)
    k0 = jax.random.normal(kk, (B, H, S, D), dtype=jnp.float32)
    v = jax.random.normal(kv, (B, H, S, D), dtype=jnp.float32)
    m0 = jax.random.normal(km, (B, H, S, S), dtype=jnp.float32) * 0.1

    out = jax.block_until_ready(attention(q, k0, v, m0))
    ref = _reference(q, k0, v, m0)
    # bf16 MXU operands + bf16 mask/K/V + approx reciprocal => relaxed tolerance
    # vs. the all-f32 reference (typical |err| ~ few e-3).
    assert jnp.allclose(out, ref, atol=2e-2, rtol=2e-2), (
        f"mismatch vs reference for shape B={B} H={H} S={S} D={D}: "
        f"max |diff| = {float(jnp.max(jnp.abs(out - ref)))}"
    )


if __name__ == "__main__":
    key = jax.random.PRNGKey(0)
    k1, k2, k3 = jax.random.split(key, 3)

    # Small shape matching the module's expected inputs (single-tile full-extent path).
    _check(B=2, H=4, S=16, D=32, key=k1)
    # Larger shape exercising the big-tile path (single 384-wide tile per axis).
    _check(B=1, H=2, S=384, D=64, key=k2)
    # Awkward length exercising the padded multi-tile online-softmax path.
    _check(B=1, H=1, S=320, D=64, key=k3)

    print("KERNEL_OK")
</pallas_src>

<mosaic_0001>
module attributes {stable_mosaic.version = 11 : i64} {
  func.func @_flash_attn_kernel(%arg0: i32, %arg1: i32, %arg2: i32, %arg3: i32, %arg4: memref<1x1x16x32xf32, #tpu.memory_space<vmem>>, %arg5: memref<1x1x16x32xbf16, #tpu.memory_space<vmem>>, %arg6: memref<1x1x16x32xbf16, #tpu.memory_space<vmem>>, %arg7: memref<1x1x16x16xbf16, #tpu.memory_space<vmem>>, %arg8: memref<1x1x16x32xf32, #tpu.memory_space<vmem>>, %arg9: memref<16x1xf32, #tpu.memory_space<vmem>>, %arg10: memref<16x1xf32, #tpu.memory_space<vmem>>, %arg11: memref<16x32xf32, #tpu.memory_space<vmem>>) attributes {dimension_semantics = [#tpu.dimension_semantics<parallel>, #tpu.dimension_semantics<parallel>, #tpu.dimension_semantics<parallel>, #tpu.dimension_semantics<arbitrary>], iteration_bounds = array<i64: 2, 4, 1, 1>, scalar_prefetch = 0 : i64, scratch_operands = 3 : i64, tpu.core_type = #tpu.core_type<tc>, window_params = [{transform_indices = @transform_0, window_bounds = array<i64: 1, 1, 16, 32>}, {transform_indices = @transform_1, window_bounds = array<i64: 1, 1, 16, 32>}, {transform_indices = @transform_2, window_bounds = array<i64: 1, 1, 16, 32>}, {transform_indices = @transform_3, window_bounds = array<i64: 1, 1, 16, 16>}, {transform_indices = @transform_4, window_bounds = array<i64: 1, 1, 16, 32>}]} {
    %c0_i32 = arith.constant 0 : i32
    %0 = arith.cmpi eq, %arg3, %c0_i32 : i32
    %1 = arith.extui %0 : i1 to i32
    %c0_i32_0 = arith.constant 0 : i32
    %2 = arith.cmpi ne, %1, %c0_i32_0 : i32
    scf.if %2 {
      %cst_34 = arith.constant 0xFF800000 : f32
      %43 = vector.broadcast %cst_34 : f32 to vector<16x1xf32>
      %c0_35 = arith.constant 0 : index
      %c0_36 = arith.constant 0 : index
      %44 = vector.load %arg9[%c0_35, %c0_36] : memref<16x1xf32, #tpu.memory_space<vmem>>, vector<16x1xf32>
      tpu.vector_store %arg9[%c0_35, %c0_36], %43 {strides = array<i32>} : memref<16x1xf32, #tpu.memory_space<vmem>>, vector<16x1xf32>,
      %cst_37 = arith.constant 0.000000e+00 : f32
      %45 = vector.broadcast %cst_37 : f32 to vector<16x1xf32>
      %c0_38 = arith.constant 0 : index
      %c0_39 = arith.constant 0 : index
      %46 = vector.load %arg10[%c0_38, %c0_39] : memref<16x1xf32, #tpu.memory_space<vmem>>, vector<16x1xf32>
      tpu.vector_store %arg10[%c0_38, %c0_39], %45 {strides = array<i32>} : memref<16x1xf32, #tpu.memory_space<vmem>>, vector<16x1xf32>,
      %cst_40 = arith.constant 0.000000e+00 : f32
      %47 = vector.broadcast %cst_40 : f32 to vector<16x32xf32>
      %c0_41 = arith.constant 0 : index
      %c0_42 = arith.constant 0 : index
      %48 = vector.load %arg11[%c0_41, %c0_42] : memref<16x32xf32, #tpu.memory_space<vmem>>, vector<16x32xf32>
      tpu.vector_store %arg11[%c0_41, %c0_42], %47 {strides = array<i32>} : memref<16x32xf32, #tpu.memory_space<vmem>>, vector<16x32xf32>,
    } else {
    }
    %c0 = arith.constant 0 : index
    %c0_1 = arith.constant 0 : index
    %c0_2 = arith.constant 0 : index
    %c0_3 = arith.constant 0 : index
    %3 = vector.load %arg4[%c0, %c0_1, %c0_2, %c0_3] : memref<1x1x16x32xf32, #tpu.memory_space<vmem>>, vector<1x1x16x32xf32>
    %4 = vector.shape_cast %3 : vector<1x1x16x32xf32> to vector<16x32xf32>
    %c0_4 = arith.constant 0 : index
    %c0_5 = arith.constant 0 : index
    %c0_6 = arith.constant 0 : index
    %c0_7 = arith.constant 0 : index
    %5 = vector.load %arg5[%c0_4, %c0_5, %c0_6, %c0_7] : memref<1x1x16x32xbf16, #tpu.memory_space<vmem>>, vector<1x1x16x32xbf16>
    %6 = vector.shape_cast %5 : vector<1x1x16x32xbf16> to vector<16x32xbf16>
    %c0_8 = arith.constant 0 : index
    %c0_9 = arith.constant 0 : index
    %c0_10 = arith.constant 0 : index
    %c0_11 = arith.constant 0 : index
    %7 = vector.load %arg6[%c0_8, %c0_9, %c0_10, %c0_11] : memref<1x1x16x32xbf16, #tpu.memory_space<vmem>>, vector<1x1x16x32xbf16>
    %8 = vector.shape_cast %7 : vector<1x1x16x32xbf16> to vector<16x32xbf16>
    %c0_12 = arith.constant 0 : index
    %c0_13 = arith.constant 0 : index
    %c0_14 = arith.constant 0 : index
    %c0_15 = arith.constant 0 : index
    %9 = vector.load %arg7[%c0_12, %c0_13, %c0_14, %c0_15] : memref<1x1x16x16xbf16, #tpu.memory_space<vmem>>, vector<1x1x16x16xbf16>
    %10 = vector.shape_cast %9 : vector<1x1x16x16xbf16> to vector<16x16xbf16>
    %11 = arith.extf %10 : vector<16x16xbf16> to vector<16x16xf32>
    %cst = arith.constant 0.176776692 : f32
    %12 = vector.broadcast %cst : f32 to vector<16x32xf32>
    %13 = arith.mulf %4, %12 : vector<16x32xf32>
    %14 = arith.truncf %13 : vector<16x32xf32> to vector<16x32xbf16>
    %cst_16 = arith.constant dense<0.000000e+00> : vector<16x16xf32>
    %15 = tpu.matmul %14, %6, %cst_16 {dimension_numbers = #tpu.dot_dimension_numbers<[1], [1], [0], [0], [0, 0, 1, 0], [], []>} : vector<16x32xbf16>, vector<16x32xbf16>, vector<16x16xf32> -> vector<16x16xf32>
    %16 = arith.addf %15, %11 : vector<16x16xf32>
    %c0_17 = arith.constant 0 : index
    %c0_18 = arith.constant 0 : index
    %17 = vector.load %arg9[%c0_17, %c0_18] : memref<16x1xf32, #tpu.memory_space<vmem>>, vector<16x1xf32>
    %cst_19 = arith.constant dense<0xFF800000> : vector<16xf32>
    %18 = vector.multi_reduction <maximumf>, %16, %cst_19 [1] : vector<16x16xf32> to vector<16xf32>
    %19 = vector.shape_cast %18 : vector<16xf32> to vector<16x1xf32>
    %20 = arith.maximumf %17, %19 : vector<16x1xf32>
    %21 = arith.subf %17, %20 : vector<16x1xf32>
    %22 = math.exp %21 : vector<16x1xf32>
    %23 = vector.broadcast %20 : vector<16x1xf32> to vector<16x16xf32>
    %24 = arith.subf %16, %23 : vector<16x16xf32>
    %25 = math.exp %24 : vector<16x16xf32>
    %c0_20 = arith.constant 0 : index
    %c0_21 = arith.constant 0 : index
    %26 = vector.load %arg10[%c0_20, %c0_21] : memref<16x1xf32, #tpu.memory_space<vmem>>, vector<16x1xf32>
    %27 = arith.mulf %22, %26 : vector<16x1xf32>
    %cst_22 = arith.constant dense<0.000000e+00> : vector<16xf32>
    %28 = vector.multi_reduction <add>, %25, %cst_22 [1] : vector<16x16xf32> to vector<16xf32>
    %29 = vector.shape_cast %28 : vector<16xf32> to vector<16x1xf32>
    %30 = arith.addf %27, %29 : vector<16x1xf32>
    %c0_23 = arith.constant 0 : index
    %c0_24 = arith.constant 0 : index
    %31 = vector.load %arg10[%c0_23, %c0_24] : memref<16x1xf32, #tpu.memory_space<vmem>>, vector<16x1xf32>
    tpu.vector_store %arg10[%c0_23, %c0_24], %30 {strides = array<i32>} : memref<16x1xf32, #tpu.memory_space<vmem>>, vector<16x1xf32>,
    %c0_25 = arith.constant 0 : index
    %c0_26 = arith.constant 0 : index
    %32 = vector.load %arg11[%c0_25, %c0_26] : memref<16x32xf32, #tpu.memory_space<vmem>>, vector<16x32xf32>
    %33 = vector.broadcast %22 : vector<16x1xf32> to vector<16x32xf32>
    %34 = arith.mulf %33, %32 : vector<16x32xf32>
    %35 = arith.truncf %25 : vector<16x16xf32> to vector<16x16xbf16>
    %cst_27 = arith.constant dense<0.000000e+00> : vector<16x32xf32>
    %36 = tpu.matmul %35, %8, %cst_27 {dimension_numbers = #tpu.dot_dimension_numbers<[1], [0], [0], [1], [0, 0, 1, 1], [], []>} : vector<16x16xbf16>, vector<16x32xbf16>, vector<16x32xf32> -> vector<16x32xf32>
    %37 = arith.addf %34, %36 : vector<16x32xf32>
    %c0_28 = arith.constant 0 : index
    %c0_29 = arith.constant 0 : index
    %38 = vector.load %arg11[%c0_28, %c0_29] : memref<16x32xf32, #tpu.memory_space<vmem>>, vector<16x32xf32>
    tpu.vector_store %arg11[%c0_28, %c0_29], %37 {strides = array<i32>} : memref<16x32xf32, #tpu.memory_space<vmem>>, vector<16x32xf32>,
    %c0_30 = arith.constant 0 : index
    %c0_31 = arith.constant 0 : index
    %39 = vector.load %arg9[%c0_30, %c0_31] : memref<16x1xf32, #tpu.memory_space<vmem>>, vector<16x1xf32>
    tpu.vector_store %arg9[%c0_30, %c0_31], %20 {strides = array<i32>} : memref<16x1xf32, #tpu.memory_space<vmem>>, vector<16x1xf32>,
    %c0_i32_32 = arith.constant 0 : i32
    %40 = arith.cmpi eq, %arg3, %c0_i32_32 : i32
    %41 = arith.extui %40 : i1 to i32
    %c0_i32_33 = arith.constant 0 : i32
    %42 = arith.cmpi ne, %41, %c0_i32_33 : i32
    scf.if %42 {
      %c0_34 = arith.constant 0 : index
      %c0_35 = arith.constant 0 : index
      %43 = vector.load %arg10[%c0_34, %c0_35] : memref<16x1xf32, #tpu.memory_space<vmem>>, vector<16x1xf32>
      %44 = tpu.reciprocal %43 {approx = true} : vector<16x1xf32> -> vector<16x1xf32>
      %c0_36 = arith.constant 0 : index
      %c0_37 = arith.constant 0 : index
      %45 = vector.load %arg11[%c0_36, %c0_37] : memref<16x32xf32, #tpu.memory_space<vmem>>, vector<16x32xf32>
      %46 = vector.broadcast %44 : vector<16x1xf32> to vector<16x32xf32>
      %47 = arith.mulf %45, %46 : vector<16x32xf32>
      %c0_38 = arith.constant 0 : index
      %c0_39 = arith.constant 0 : index
      %c0_40 = arith.constant 0 : index
      %c0_41 = arith.constant 0 : index
      %48 = vector.load %arg8[%c0_38, %c0_39, %c0_40, %c0_41] : memref<1x1x16x32xf32, #tpu.memory_space<vmem>>, vector<1x1x16x32xf32>
      %49 = vector.shape_cast %48 : vector<1x1x16x32xf32> to vector<16x32xf32>
      %50 = vector.shape_cast %47 : vector<16x32xf32> to vector<1x1x16x32xf32>
      tpu.vector_store %arg8[%c0_38, %c0_39, %c0_40, %c0_41], %50 {strides = array<i32>} : memref<1x1x16x32xf32, #tpu.memory_space<vmem>>, vector<1x1x16x32xf32>,
    } else {
    }
    return
  }
  func.func @transform_0(%arg0: i32, %arg1: i32, %arg2: i32, %arg3: i32) -> (i32, i32, i32, i32) {
    %c0_i32 = arith.constant 0 : i32
    %c0_i32_0 = arith.constant 0 : i32
    return %arg0, %arg1, %arg2, %c0_i32 : i32, i32, i32, i32
  }
  func.func @transform_1(%arg0: i32, %arg1: i32, %arg2: i32, %arg3: i32) -> (i32, i32, i32, i32) {
    %c0_i32 = arith.constant 0 : i32
    %c0_i32_0 = arith.constant 0 : i32
    return %arg0, %arg1, %arg3, %c0_i32 : i32, i32, i32, i32
  }
  func.func @transform_2(%arg0: i32, %arg1: i32, %arg2: i32, %arg3: i32) -> (i32, i32, i32, i32) {
    %c0_i32 = arith.constant 0 : i32
    %c0_i32_0 = arith.constant 0 : i32
    return %arg0, %arg1, %arg3, %c0_i32 : i32, i32, i32, i32
  }
  func.func @transform_3(%arg0: i32, %arg1: i32, %arg2: i32, %arg3: i32) -> (i32, i32, i32, i32) {
    %c0_i32 = arith.constant 0 : i32
    return %arg0, %arg1, %arg2, %arg3 : i32, i32, i32, i32
  }
  func.func @transform_4(%arg0: i32, %arg1: i32, %arg2: i32, %arg3: i32) -> (i32, i32, i32, i32) {
    %c0_i32 = arith.constant 0 : i32
    %c0_i32_0 = arith.constant 0 : i32
    return %arg0, %arg1, %arg2, %c0_i32 : i32, i32, i32, i32
  }
}

</mosaic_0001>

<bundles_post_ra>
// kernel: tpu_custom_call.1
= control target key start
LH: loop header
LB: loop body
LE: loop exit
PB: predicated region body
PF: predicated region fallthrough
CT: control target
= control target key end

     0   :  { %s1638_s0 = inlined_call_operand.hbm [shape: f32[2,4,16,32], index: 0, kind: input, shape index: {}]   ;;  %s1639_s1 = inlined_call_operand.hbm [shape: bf16[2,4,16,32], index: 1, kind: input, shape index: {}]   ;;  %s1640_s2 = inlined_call_operand.hbm [shape: bf16[2,4,16,32], index: 2, kind: input, shape index: {}]   ;;  %s1641_s3 = inlined_call_operand.hbm [shape: bf16[2,4,16,16], index: 3, kind: input, shape index: {}]   ;;  %s1642_s4 = inlined_call_operand.hbm [shape: f32[2,4,16,32], index: 4, kind: output, shape index: {}]  }
   0x1   :  { %1655 = sst [smem:[#allocation25_spill]] %s1639_s1 }
   0x2   :  { %9 = vsyncpa [#allocation6], 0 }
   0x3   :  { %11 = vsyncpa [#allocation6 + $0x1], 0 }
   0x4   :  { %12 = vsyncpa [#allocation9], 0 }
   0x5   :  { %14 = vsyncpa [#allocation9 + $0x1], 0 }
   0x6   :  { %15 = vsyncpa [#allocation12], 0 }
   0x7   :  { %17 = vsyncpa [#allocation12 + $0x1], 0 }
   0x8   :  { %18 = vsyncpa [#allocation7], 0 }
   0x9   :  { %20 = vsyncpa [#allocation7 + $0x1], 0  ;;  %s1267_s15 = smov 0   ;;  %s1269_s16 = smov 0  }
   0xa   :  { %s1271_s17 = smov 0   ;;  %s1273_s18 = smov 0  }
   0xb   :  { %s1275_s19 = smov 0   ;;  %s1277_s20 = smov 0  }
   0xc   :  { %s1279_s21 = smov 0   ;;  %s1281_s22 = smov 0  }
   0xd LB: > { %1656 = sst [smem:[#allocation18_spill]] %s1205_s17  ;;  %s1308_s23 = sadd.s32 4294967295, %s1225_s22   ;;  %s1225_s22 = sphi %s1281_s22, %s26_s22   ;;  %s1221_s21 = sphi %s1279_s21, %s1684_s21   ;;  %s1217_s20 = sphi %s1277_s20, %s1683_s20   ;;  %s1213_s19 = sphi %s1275_s19, %s1682_s19   ;;  %s1209_s18 = sphi %s1273_s18, %s1681_s18   ;;  %s1205_s17 = sphi %s1271_s17, %s1680_s17   ;;  %s1201_s16 = sphi %s1269_s16, %s1686_s16   ;;  %s1197_s15 = sphi %s1267_s15, %s1685_s15  }
   0xe   : > { %1657 = sst [smem:[#allocation19_spill]] %s1217_s20  ;;  %s825_s24 = sadd.s32 4294967294, %s1225_s22  }
   0xf   : > { %1658 = sst [smem:[#allocation20_spill]] %s1221_s21  ;;  %s48_s25 = sadd.s32 1, %s1217_s20 }
  0x10   : > { %s52_s26 = sadd.s32 1, %s1221_s21  ;;  %p50_p0 = scmp.ge.s32.totalorder %s48_s25, 4 }
  0x11   : > { %s63_s27 = sadd.s32 1, %s1205_s17  ;;  %p70_p1 = scmp.ne.s32.totalorder %s1205_s17, %s1201_s16 }
  0x12   : > { %p71_p2 = scmp.eq.s32.totalorder %s1225_s22, 0  ;;  %s1688_s25 = smov (%p50_p0, %s48_s25), 0 }
  0x13   : > { %1659 = sst [smem:[#allocation21_spill]] %s1688_s25  ;;  %s1690_s26 = smov (!%p50_p0, %s52_s26), %s1221_s21 }
  0x14   : > { %s57_s28 = ssub.s32 %s1217_s20, %s1688_s25  ;;  %p1322_p3 = por %p71_p2, %p70_p1 }
  0x15   : > { %p54_p4 = scmp.ge.s32.totalorder %s1690_s26, 2  ;;  %p76_p5 = scmp.ne.s32.totalorder %s1201_s16, %s1197_s15 }
  0x16   : > { %p77_p6 = scmp.eq.s32.totalorder %s1308_s23, 0  ;;  %p196_p7 = scmp.eq.s32.totalorder %s1308_s23, 7 }
  0x17   : > { %s1692_s26 = smov (%p54_p4, %s1690_s26), 0  ;;  %p202_p10 = scmp.eq.s32.totalorder %s825_s24, 7 }
  0x18   : > { %1661 = sst [smem:[#allocation22_spill]] %s1692_s26  ;;  %p1332_p8 = por %p77_p6, %p76_p5 }
  0x19   : > { %p1336_p9 = por %p196_p7, %p70_p1  ;;  %s56_s6 = ssub.s32 %s1221_s21, %s1692_s26 }
  0x1a   : > { %s1662_s30 = scalar_select %p1332_p8, 1, 0 }
  0x1b   : > { %s1663_s5 = scalar_select %p1336_p9, 1, 0 }
  0x1c   : > { %s58_s7 = sor.u32 %s57_s28, %s56_s6  ;;  %p1342_p12 = por %p202_p10, %p76_p5 }
  0x1d   : > { %p61_p11 = scmp.eq.s32.totalorder %s58_s7, 0  ;;  %p907_p13 = scmp.lt.s32.totalorder %s1225_s22, 8 }
  0x1e   : > { %s1664_s8 = scalar_select %p1342_p12, 1, 0 }
  0x1f   : > { %s1348_s9 = sand.u32 1, %s1205_s17   ;;  %s829_s11 = sshll.u32 %s1217_s20, 1 }
  0x20   : > { %1665 = sst [smem:[#allocation23_spill]] %s1664_s8  ;;  %s830_s12 = sshll.u32 %s1221_s21, 3 }
  0x21   : > { %s1351_s10 = scalar_select %p61_p11, %s1205_s17, %s63_s27  }
  0x22   : > { %s1355_s13 = sadd.s32 %s830_s12, %s829_s11  ;;  %p1359_p0 = pnand %p907_p13, %p1322_p3 }
  0x23   : > { %1666 = sst [smem:[#allocation24_spill]] %s1351_s10  ;;  %s247_s24 = sand.u32 1, %s1225_s22  }
  0x24   : > { %s1365_s28 = sshll.u32 %s1348_s9, 3  ;;  %s1368_s6 = sshll.u32 %s1355_s13, 6 }
  0x25   : > { %s1668_s1 = sld [smem:[#allocation25_spill]]  ;;  %s251_s29 = scalar_lea.vmem [#allocation8], %s1365_s28 }
  0x26   : > { %s262_s11 = sshll.u32 %s251_s29, 4  ;;  %s1380_s12 = scalar_lea.sflag [#allocation9], %s247_s24  ;;  %s1377_s11 = int_to_ptr.vmem [resolvable:$true] %s262_s11 }
  0x27   : > { %p1386_p3 = pneg %p1359_p0 }
  0x2b   : > { %s1374_s26 = scalar_lea.hbm %s1668_s1, %s1368_s6  ;;  %s1004_s29 = scalar_lea.hbm %s1668_s1, 1024 }
  0x2c   : > { %s999_s25 = scalar_lea.hbm %s1374_s26, 128  ;;  %p1005_p6 = scmp.lt.u32.totalorder %s1374_s26, %s1668_s1 }
  0x2d   : > { %p1000_p2 = scmp.ne.s32.totalorder %s1374_s26, %s999_s25  ;;  %p1006_p7 = scmp.lt.u32.totalorder %s1004_s29, %s999_s25 }
  0x2e   : > { %p1008_p11 = scmp.lt.u32.totalorder %s999_s25, %s1374_s26 }
  0x2f   : > { %p1002_p4 = pnand %p1386_p3, %p1000_p2  ;;  %p1007_p10 = por %p1006_p7, %p1005_p6 }
  0x31   : > { %p1003_p5 = pneg %p1002_p4  ;;  %p1009_p13 = por %p1008_p11, %p1007_p10 }
  0x33   : > { %p1010_p1 = pnand %p1009_p13, %p1003_p5 }
  0x35   : > { %1013 = shalt.err (!%p1010_p1)
}
  0x36   : > { %s1014_s24 = scalar_lea.vmem %s1377_s11, 128  ;;  %s1227_s27 = smov [#allocation8]  }
  0x37   : > { %p1015_p2 = scmp.ne.s32.totalorder %s1377_s11, %s1014_s24  ;;  %s1019_s7 = sshll.u32 %s1227_s27, 4  ;;  %s1020_s7 = int_to_ptr.vmem [resolvable:$false] %s1019_s7 }
  0x38   : > { %s1021_s20 = scalar_lea.vmem %s1020_s7, 256  ;;  %p1022_p9 = scmp.lt.s32.totalorder %s1377_s11, %s1020_s7 }
  0x39   : > { %p1017_p4 = pnand %p1015_p2, %p1386_p3  ;;  %p1023_p8 = scmp.lt.s32.totalorder %s1021_s20, %s1014_s24 }
  0x3b   : > { %p1018_p12 = pneg %p1017_p4  ;;  %p1024_p6 = por %p1023_p8, %p1022_p9 }
  0x3d   : > { %p1025_p7 = pnand %p1024_p6, %p1018_p12 }
  0x3f   : > { %1028 = shalt.err (!%p1025_p7)
}
  0x40   : > { %s1651_s25 = smov 64   ;;  %s1653_s10 = smov 4  }
  0x41   : > { %896 = dma.hbm_to_vmem [thread:$0]  (!%p1359_p0), %s1374_s26, 128, %s1377_s11, %s1380_s12, %s1651_s25, %s1651_s25, %s1653_s10  }
  0x42   : > { %p321_p8 = scmp.lt.s32.totalorder %s1225_s22, 9  ;;  %p1670_p9 = scmp.ge.s32.totalorder %s1225_s22, 1 }
  0x43   : > { %s828_s24 = sshll.u32 %s1348_s9, 4  ;;  %s831_s27 = sshll.u32 %s1355_s13, 7 }
  0x44   : > { %p1416_p12 = pnand %p1670_p9, %p321_p8  ;;  %s1425_s1 = scalar_lea.hbm %s1638_s0, %s831_s27 }
  0x45   : > { %s226_s17 = scalar_lea.vmem [#allocation5], %s828_s24  ;;  %s223_s26 = scalar_lea.sflag [#allocation6], %s1348_s9 }
  0x46   : > { %s1671_s29 = scalar_select %p1416_p12, 1, 0 }
  0x47   : > { %s237_s8 = sshll.u32 %s226_s17, 4  ;;  %s1029_s11 = scalar_lea.hbm %s1425_s1, 256  ;;  %s1427_s8 = int_to_ptr.vmem [resolvable:$true] %s237_s8 }
  0x48   : > { %p1030_p1 = scmp.ne.s32.totalorder %s1425_s1, %s1029_s11  ;;  %s1034_s7 = scalar_lea.hbm %s1638_s0, 2048 }
  0x49   : > { %p1035_p11 = scmp.lt.u32.totalorder %s1425_s1, %s1638_s0  ;;  %p1036_p13 = scmp.lt.u32.totalorder %s1034_s7, %s1029_s11 }
  0x4a   : > { %p1032_p5 = pnand %p1030_p1, %p1386_p3  ;;  %p1038_p4 = scmp.lt.u32.totalorder %s1029_s11, %s1425_s1 }
  0x4b   : > { %p1037_p2 = por %p1036_p13, %p1035_p11 }
  0x4c   : > { %p1033_p10 = pneg %p1032_p5 }
  0x4d   : > { %p1039_p6 = por %p1038_p4, %p1037_p2 }
  0x4f   : > { %p1040_p7 = pnand %p1039_p6, %p1033_p10 }
  0x51   : > { %1043 = shalt.err (!%p1040_p7)
}
  0x52   : > { %s1044_s17 = scalar_lea.vmem %s1427_s8, 256  ;;  %s1230_s25 = smov [#allocation5]  }
  0x53   : > { %p1045_p8 = scmp.ne.s32.totalorder %s1427_s8, %s1044_s17  ;;  %s1049_s24 = sshll.u32 %s1230_s25, 4  ;;  %s1050_s24 = int_to_ptr.vmem [resolvable:$false] %s1049_s24 }
  0x54   : > { %s1051_s13 = scalar_lea.vmem %s1050_s24, 512  ;;  %p1052_p5 = scmp.lt.s32.totalorder %s1427_s8, %s1050_s24 }
  0x55   : > { %p1047_p9 = pnand %p1045_p8, %p1386_p3  ;;  %p1053_p12 = scmp.lt.s32.totalorder %s1051_s13, %s1044_s17 }
  0x57   : > { %p1048_p1 = pneg %p1047_p9  ;;  %p1054_p11 = por %p1053_p12, %p1052_p5 }
  0x59   : > { %p1055_p13 = pnand %p1054_p11, %p1048_p1 }
  0x5b   : > { %1058 = shalt.err (!%p1055_p13)
}
  0x5c   : > { %s1231_s11 = smov 128   ;;  %s1232_s7 = smov 8  }
  0x5d   : > { %893 = dma.hbm_to_vmem [thread:$0]  (!%p1359_p0), %s1425_s1, 256, %s1427_s8, %s223_s26, %s1231_s11, %s1231_s11, %s1232_s7  }
  0x5e   : > { %s1457_s25 = scalar_lea.hbm %s1640_s2, %s1368_s6  ;;  %s276_s17 = scalar_lea.vmem [#allocation10], %s1365_s28 }
  0x5f   : > { %s287_s24 = sshll.u32 %s276_s17, 4  ;;  %s1059_s13 = scalar_lea.hbm %s1457_s25, 128  ;;  %s1460_s24 = int_to_ptr.vmem [resolvable:$true] %s287_s24 }
  0x60   : > { %p1060_p12 = scmp.ne.s32.totalorder %s1457_s25, %s1059_s13  ;;  %s1064_s8 = scalar_lea.hbm %s1640_s2, 1024 }
  0x61   : > { %p1065_p4 = scmp.lt.u32.totalorder %s1457_s25, %s1640_s2  ;;  %p1066_p6 = scmp.lt.u32.totalorder %s1064_s8, %s1059_s13 }
  0x62   : > { %p1062_p10 = pnand %p1060_p12, %p1386_p3  ;;  %p1068_p8 = scmp.lt.u32.totalorder %s1059_s13, %s1457_s25 }
  0x63   : > { %p1067_p7 = por %p1066_p6, %p1065_p4 }
  0x64   : > { %p1063_p2 = pneg %p1062_p10 }
  0x65   : > { %p1069_p9 = por %p1068_p8, %p1067_p7 }
  0x67   : > { %p1070_p1 = pnand %p1069_p9, %p1063_p2 }
  0x69   : > { %1073 = shalt.err (!%p1070_p1)
}
  0x6a   : > { %s1074_s7 = scalar_lea.vmem %s1460_s24, 128  ;;  %s1233_s10 = smov [#allocation10]  }
  0x6b   : > { %p1075_p5 = scmp.ne.s32.totalorder %s1460_s24, %s1074_s7  ;;  %s1079_s27 = sshll.u32 %s1233_s10, 4  ;;  %s1080_s27 = int_to_ptr.vmem [resolvable:$false] %s1079_s27 }
  0x6c   : > { %s1081_s20 = scalar_lea.vmem %s1080_s27, 256  ;;  %p1082_p12 = scmp.lt.s32.totalorder %s1460_s24, %s1080_s27 }
  0x6d   : > { %p1077_p11 = pnand %p1075_p5, %p1386_p3  ;;  %p1083_p10 = scmp.lt.s32.totalorder %s1081_s20, %s1074_s7 }
  0x6f   : > { %p1078_p13 = pneg %p1077_p11  ;;  %p1084_p4 = por %p1083_p10, %p1082_p12 }
  0x71   : > { %p1085_p6 = pnand %p1084_p4, %p1078_p13 }
  0x73   : > { %1088 = shalt.err (!%p1085_p6)
}
  0x74   : > { %s1672_s17 = smov 4   ;;  %s1673_s13 = smov 64  }
  0x75   : > { %899 = dma.hbm_to_vmem [thread:$0]  (!%p1359_p0), %s1457_s25, 128, %s1460_s24, %s1380_s12, %s1673_s13, %s1673_s13, %s1672_s17  }
  0x76   : > { %s1491_s26 = scalar_lea.hbm %s1641_s3, %s1368_s6  ;;  %s301_s11 = scalar_lea.vmem [#allocation11], %s1365_s28 }
  0x77   : > { %s313_s7 = sshll.u32 %s301_s11, 4  ;;  %s298_s10 = scalar_lea.sflag [#allocation12], %s1348_s9  ;;  %s1494_s7 = int_to_ptr.vmem [resolvable:$true] %s313_s7 }
  0x78   : > { %s1089_s27 = scalar_lea.hbm %s1491_s26, 128  ;;  %s1094_s24 = scalar_lea.hbm %s1641_s3, 1024 }
  0x79   : > { %p1090_p2 = scmp.ne.s32.totalorder %s1491_s26, %s1089_s27  ;;  %p1095_p9 = scmp.lt.u32.totalorder %s1491_s26, %s1641_s3 }
  0x7a   : > { %p1096_p1 = scmp.lt.u32.totalorder %s1094_s24, %s1089_s27  ;;  %p1098_p11 = scmp.lt.u32.totalorder %s1089_s27, %s1491_s26 }
  0x7b   : > { %p1092_p7 = pnand %p1090_p2, %p1386_p3 }
  0x7c   : > { %p1097_p5 = por %p1096_p1, %p1095_p9 }
  0x7d   : > { %p1093_p8 = pneg %p1092_p7 }
  0x7e   : > { %p1099_p13 = por %p1098_p11, %p1097_p5 }
  0x80   : > { %p1100_p12 = pnand %p1099_p13, %p1093_p8 }
  0x82   : > { %1103 = shalt.err (!%p1100_p12)
}
  0x83   : > { %s1104_s28 = scalar_lea.vmem %s1494_s7, 128  ;;  %s1234_s1 = smov [#allocation11]  }
  0x84   : > { %p1105_p10 = scmp.ne.s32.totalorder %s1494_s7, %s1104_s28  ;;  %s1109_s8 = sshll.u32 %s1234_s1, 4  ;;  %s1110_s8 = int_to_ptr.vmem [resolvable:$false] %s1109_s8 }
  0x85   : > { %s1111_s11 = scalar_lea.vmem %s1110_s8, 256  ;;  %p1112_p2 = scmp.lt.s32.totalorder %s1494_s7, %s1110_s8 }
  0x86   : > { %p1107_p4 = pnand %p1105_p10, %p1386_p3  ;;  %p1113_p7 = scmp.lt.s32.totalorder %s1111_s11, %s1104_s28 }
  0x88   : > { %p1108_p6 = pneg %p1107_p4  ;;  %p1114_p9 = por %p1113_p7, %p1112_p2 }
  0x8a   : > { %p1115_p1 = pnand %p1114_p9, %p1108_p6 }
  0x8c   : > { %1118 = shalt.err (!%p1115_p1)
}
  0x8d   : > { %902 = dma.hbm_to_vmem [thread:$0]  (!%p1359_p0), %s1491_s26, 128, %s1494_s7, %s298_s10, %s1673_s13, %s1673_s13, %s1672_s17  }
  0x8e   : > { %p1674_p3 = scmp.ne.s32.totalorder %s1671_s29, 0 }
  0x8f   : > { %s1526_s21 = sand.u32 (!%p1674_p3), 1, %s1201_s16   ;;  %p1675_p8 = scmp.ne.s32.totalorder (!%p1674_p3), %s1662_s30, 0 }
  0x90   : > { %325 = sbr.rel (%p1674_p3) target bundleno = 983 (0x3d7), region = 36  ;;  %s845_s27 = sshll.u32 (!%p1674_p3), %s1526_s21, 4 }
  0x91   : > { %s328_s14 = scalar_lea.sflag (!%p1674_p3), [#allocation6], %s1526_s21  ;;  %s331_s12 = scalar_lea.vmem (!%p1674_p3), [#allocation5], %s845_s27 }
  0x97   : > { %1180 = dma.done.wait (%p1675_p8), %s328_s14, 256  }
  0x98   : > { %1182 = vsyncadd (%p1675_p8), %s328_s14, 4294967040  ;;  %s336_s9 = sand.u32 1, %s1308_s23   ;;  %s1538_s29 = sshll.u32 %s1526_s21, 3 }
  0x99   : > { %s337_s17 = scalar_lea.sflag [#allocation9], %s336_s9  ;;  %s340_s13 = scalar_lea.vmem [#allocation8], %s1538_s29 }
  0x9a   : > { %1184 = dma.done.wait (%p1675_p8), %s337_s17, 256  }
  0x9b   : > { %1186 = vsyncadd (%p1675_p8), %s337_s17, 4294967040  ;;  %s349_s26 = scalar_lea.vmem [#allocation10], %s1538_s29  ;;  %s355_s7 = scalar_lea.sflag [#allocation12], %s1526_s21 }
  0x9c   : > { %s358_s10 = scalar_lea.vmem [#allocation11], %s1538_s29 }
  0x9d   : > { %1188 = dma.done.wait (%p1675_p8), %s355_s7, 128  }
  0x9e   : > { %1190 = vsyncadd (%p1675_p8), %s355_s7, 4294967168  ;;  %vm413_vm0 = vcmask 261120   ;;  %v1235_v0 = vmov 0.0   ;;  %vm1236_vm1 = vmmov 0   ;;  %v985_v1 = vld [vmem:[%s340_s13] sm:$0xff]   ;;  %v417_v3 = vld [vmem:[%s331_s12 + $0x8] sm:$0xff] }
  0x9f   : > { %868 = vmatprep.subr.bf16.mxu0 %v1235_v0  ;;  %414 = vst.msk [vmem:[#allocation4] sm:$0xff] %vm413_vm0, %v1235_v0  ;;  %415 = vst.msk [vmem:[#allocation4 + $0x8] sm:$0xff] %vm413_vm0, %v1235_v0  ;;  %870 = vmatprep.mubr.msk.bf16.mxu0 %vm1236_vm1, %v1235_v0  ;;  %v416_v2 = vld [vmem:[%s331_s12] sm:$0xff]  ;;  %v439_v4 = vsel %vm413_vm0, %v985_v1, 0  ;;  %v427_v6 = vmul.f32 0.17677669, %v417_v3 }
  0xa0   : > { %874 = vmatprep.subr.bf16.mxu1 %v1235_v0  ;;  %876 = vmatprep.mubr.msk.bf16.mxu1 %vm1236_vm1, %v1235_v0  ;;  %v426_v5 = vmul.f32 0.17677669, %v416_v2  ;;  %vm408_vm2 = vcmask 7168   ;;  %v1237_v8 = vmov -inf   ;;  %v861_v9 = vld [vmem:[%s358_s10] sm:$0xff]   ;;  %vm484_vm3 = vcmask 130048  }
  0xa1   : > { %869 = vmatpush3.bf16.xpose.msra.mxu0 %v439_v4  ;;  %409 = vst.msk [vmem:[#allocation2] sm:$0xff] %vm408_vm2, %v1237_v8  ;;  %410 = vst.msk [vmem:[#allocation2 + $0x8] sm:$0xff] %vm408_vm2, %v1237_v8  ;;  %v862_v10 = vunpack.c.l.bf16 %v861_v9  ;;  %v863_v11 = vunpack.c.h.bf16 %v861_v9  ;;  %v1238_v20 = vmov 0   ;;  %v986_v29 = vld [vmem:[%s349_s26] sm:$0xff]   ;;  %s855_s23 = sshll.u32 %s1209_s18, 1  ;;  %s856_s30 = sshll.u32 %s1213_s19, 3 }
  0xa2   : > { %v428_v7 = vpack.c.bf16 %v427_v6, %v426_v5  ;;  %411 = vst.msk [vmem:[#allocation3] sm:$0xff] %vm408_vm2, %v1235_v0  ;;  %412 = vst.msk [vmem:[#allocation3 + $0x8] sm:$0xff] %vm408_vm2, %v1235_v0  ;;  %983 = vset.pattern.permute.xlu1 %v1238_v20  ;;  %984 = vset.pattern.permute.xlu0 %v1238_v20  ;;  %s639_s25 = sadd.s32 %s856_s30, %s855_s23  ;;  %s397_s24 = scalar_lea.vmem [#allocation13], %s845_s27 }
  0xa3   : > { %875 = vmatpush3.bf16.msra.mxu1 %v986_v29  ;;  %s642_s6 = sshll.u32 %s397_s24, 4  ;;  %s857_s20 = sshll.u32 %s639_s25, 7  ;;  %s1577_s6 = int_to_ptr.vmem [resolvable:$true] %s642_s6 }
  0xa4   : > { %s1583_s28 = scalar_lea.hbm %s1642_s4, %s857_s20  ;;  %s625_s1 = scalar_lea.sflag [#allocation7], %s1526_s21 }
  0xa5   : > { %s1119_s8 = scalar_lea.vmem %s1577_s6, 256  ;;  %p1676_p5 = scmp.ne.s32.totalorder %s1663_s5, 0 }
  0xa6   : > { %v530_v57 = vld [vmem:[#allocation4] sm:$0xff]  ;;  %v531_v59 = vld [vmem:[#allocation4 + $0x8] sm:$0xff]  ;;  %p1120_p0 = scmp.ne.s32.totalorder %s1577_s6, %s1119_s8  ;;  %s1239_s11 = smov [#allocation13]  }
  0xa7   : > { %s1123_s27 = sshll.u32 %s1239_s11, 4  ;;  %s1124_s27 = int_to_ptr.vmem [resolvable:$false] %s1123_s27 }
  0xa8   : > { %871 = vmatmul.mubr.msk.bf16.vlgmr.msra.gmra.mrb[0].mxu0 %vm413_vm0, %v428_v7  ;;  %v482_v21 = vld [vmem:[#allocation2] sm:$0xff]  ;;  %v483_v24 = vld [vmem:[#allocation2 + $0x8] sm:$0xff]  ;;  %p1121_p11 = pnand %p1120_p0, %p1676_p5  ;;  %s1125_s14 = scalar_lea.vmem %s1124_s27, 512 }
  0xa9   : > { %v515_v45 = vld [vmem:[#allocation3] sm:$0xff]  ;;  %v516_v48 = vld [vmem:[#allocation3 + $0x8] sm:$0xff]  ;;  %p1126_p12 = scmp.lt.s32.totalorder %s1577_s6, %s1124_s27  ;;  %p1127_p10 = scmp.lt.s32.totalorder %s1125_s14, %s1119_s8 }
  0xaa   : > { %p1122_p13 = pneg %p1121_p11 }
  0xab   : > { %p1128_p4 = por %p1127_p10, %p1126_p12 }
  0xad   : > { %p1129_p6 = pnand %p1128_p4, %p1122_p13 }
 0x17b   : > { %v475_v12 = vpop.f32.mrb[0].mxu0 }
 0x17c   : > { %v476_v13 = vadd.f32 %v862_v10, %v475_v12  ;;  %v872_v14 = vpop.f32.mrb[1].mxu0 }
 0x17d   : > { %v478_v15 = vpop.f32.mrb[2].mxu0 }
 0x17e   : > { %v479_v16 = vadd.f32 %v863_v11, %v478_v15  ;;  %v873_v17 = vpop.f32.mrb[3].mxu0  ;;  %v485_v18 = vsel %vm484_vm3, %v476_v13, -inf }
 0x17f   : > { %486 = vmax.xlane.f32.xlu0 %v485_v18 }
 0x180   : > { %v488_v19 = vsel %vm484_vm3, %v479_v16, -inf }
 0x183   : > { %489 = vmax.xlane.f32.xlu0 %v488_v19 }
 0x20c   : > { %v487_v22 = vpop.xlane.xlu0 %486 }
 0x20d   : > { %v491_v23 = vmax.f32 %v482_v21, %v487_v22 }
 0x20f   : > { %v493_v25 = vsub.f32 %v482_v21, %v491_v23  ;;  %599 = vst.msk [vmem:[#allocation2] sm:$0xff] %vm408_vm2, %v491_v23  ;;  %501 = vperm.xlu1 %983, %v491_v23  }
 0x210   : > { %v490_v26 = vpop.xlane.xlu0 %489 }
 0x211   : > { %v492_v27 = vmax.f32 %v483_v24, %v490_v26  ;;  %v495_v42 = vmul.f32 1.442695, %v493_v25 }
 0x213   : > { %v494_v28 = vsub.f32 %v483_v24, %v492_v27  ;;  %600 = vst.msk [vmem:[#allocation2 + $0x8] sm:$0xff] %vm408_vm2, %v492_v27  ;;  %506 = vperm.xlu1 %983, %v492_v27  }
 0x215   : > { %v497_v41 = vmul.f32 1.442695, %v494_v28 }
 0x28e   : > { %v502_v30 = vpop.permute.xlu1 %501 }
 0x28f   : > { %v509_v31 = vsub.f32 %v476_v13, %v502_v30 }
 0x291   : > { %v511_v32 = vmul.f32 1.442695, %v509_v31 }
 0x292   : > { %v507_v33 = vpop.permute.xlu1 %506 }
 0x293   : > { %987 = vpow2.f32 %v511_v32  ;;  %v510_v34 = vsub.f32 %v479_v16, %v507_v33 }
 0x295   : > { %v513_v35 = vmul.f32 1.442695, %v510_v34 }
 0x297   : > { %989 = vpow2.f32 %v513_v35 }
 0x298   : > { %991 = vpow2.f32 %v497_v41 }
 0x299   : > { %993 = vpow2.f32 %v495_v42 }
 0x29d   : > { %v988_v36 = vpop.eup %987 }
 0x29e   : > { %v519_v37 = vsel %vm484_vm3, %v988_v36, 0.0 }
 0x29f   : > { %520 = vadd.xlane.f32.xlu0 %v519_v37 }
 0x2a1   : > { %v990_v38 = vpop.eup %989 }
 0x2a2   : > { %v522_v39 = vsel %vm484_vm3, %v990_v38, 0.0  ;;  %v544_v40 = vpack.c.bf16 %v990_v38, %v988_v36  ;;  %v992_v43 = vpop.eup %991 }
 0x2a3   : > { %523 = vadd.xlane.f32.xlu1 %v522_v39  ;;  %v994_v44 = vpop.eup %993  ;;  %v518_v50 = vmul.f32 %v992_v43, %v516_v48 }
 0x2a4   : > { %877 = vmatmul.mubr.msk.bf16.vlgmr.msra.gmra.mrb[0].mxu1 %vm484_vm3, %v544_v40  ;;  %v517_v46 = vmul.f32 %v994_v44, %v515_v45 }
 0x2b4   : > { %539 = vperm.xlu1 %983, %v992_v43  }
 0x2b5   : > { %534 = vperm.xlu0 %984, %v994_v44  }
 0x32c   : > { %v521_v47 = vpop.xlane.xlu0 %520 }
 0x32d   : > { %v525_v49 = vadd.f32 %v521_v47, %v517_v46 }
 0x32f   : > { %528 = vst.msk [vmem:[#allocation3] sm:$0xff] %vm408_vm2, %v525_v49 }
 0x330   : > { %v524_v51 = vpop.xlane.xlu1 %523 }
 0x331   : > { %v526_v52 = vadd.f32 %v524_v51, %v518_v50 }
 0x333   : > { %529 = vst.msk [vmem:[#allocation3 + $0x8] sm:$0xff] %vm408_vm2, %v526_v52 }
 0x334   : > { %v535_v58 = vpop.permute.xlu0 %534  ;;  %v540_v60 = vpop.permute.xlu1 %539 }
 0x335   : > { %v542_v61 = vmul.f32 %v535_v58, %v530_v57  ;;  %v543_v63 = vmul.f32 %v540_v60, %v531_v59 }
 0x336   : > { %v604_v53 = vld [vmem:[#allocation3] sm:$0xff] }
 0x337   : > { %995 = vrcp.f32 %v604_v53 }
 0x33a   : > { %v605_v54 = vld [vmem:[#allocation3 + $0x8] sm:$0xff] }
 0x33b   : > { %997 = vrcp.f32 %v605_v54 }
 0x341   : > { %v996_v55 = vpop.eup %995 }
 0x342   : > { %612 = vperm.xlu0 %984, %v996_v55  }
 0x345   : > { %v998_v56 = vpop.eup %997 }
 0x346   : > { %617 = vperm.xlu0 %984, %v998_v56  }
 0x377   : > { %v588_v62 = vpop.f32.mrb[0].mxu1 }
 0x378   : > { %v595_v0 = vadd.f32 %v588_v62, %v542_v61  ;;  %v878_v1 = vpop.f32.mrb[1].mxu1 }
 0x379   : > { %v591_v2 = vpop.f32.mrb[2].mxu1 }
 0x37a   : > { %597 = vst.msk [vmem:[#allocation4] sm:$0xff] %vm413_vm0, %v595_v0  ;;  %v596_v3 = vadd.f32 %v591_v2, %v543_v63  ;;  %v879_v4 = vpop.f32.mrb[3].mxu1 }
 0x37c   : > { %598 = vst.msk [vmem:[#allocation4 + $0x8] sm:$0xff] %vm413_vm0, %v596_v3 }
 0x381   : > { %v608_v5 = vld [vmem:[#allocation4] sm:$0xff] }
 0x383   : > { %v609_v8 = vld [vmem:[#allocation4 + $0x8] sm:$0xff] }
 0x3c1   : > { %v613_v6 = vpop.permute.xlu0 %612 }
 0x3c2   : > { %v620_v7 = vmul.f32 %v613_v6, %v608_v5 }
 0x3c4   : > { %622 = vst.msk [vmem:[%s397_s24] sm:$0xff] %vm413_vm0, %v620_v7 }
 0x3c5   : > { %v618_v9 = vpop.permute.xlu0 %617 }
 0x3c6   : > { %v621_v10 = vmul.f32 %v618_v9, %v609_v8 }
 0x3c8   : > { %623 = vst.msk [vmem:[%s397_s24 + $0x8] sm:$0xff] %vm413_vm0, %v621_v10 }
 0x3c9   : > { %1132 = shalt.err (!%p1129_p6)
}
 0x3ca   : > { %s1133_s12 = scalar_lea.hbm %s1583_s28, 256  ;;  %s1137_s17 = scalar_lea.hbm %s1642_s4, 2048 }
 0x3cb   : > { %p1134_p2 = scmp.ne.s32.totalorder %s1583_s28, %s1133_s12  ;;  %p1138_p1 = scmp.lt.u32.totalorder %s1583_s28, %s1642_s4 }
 0x3cc   : > { %p1139_p3 = scmp.lt.u32.totalorder %s1137_s17, %s1133_s12  ;;  %p1141_p0 = scmp.lt.u32.totalorder %s1133_s12, %s1583_s28 }
 0x3cd   : > { %p1135_p7 = pnand %p1134_p2, %p1676_p5 }
 0x3ce   : > { %p1140_p8 = por %p1139_p3, %p1138_p1 }
 0x3cf   : > { %p1136_p9 = pneg %p1135_p7 }
 0x3d0   : > { %p1142_p11 = por %p1141_p0, %p1140_p8 }
 0x3d2   : > { %p1143_p13 = pnand %p1142_p11, %p1136_p9 }
 0x3d4   : > { %1146 = shalt.err (!%p1143_p13)
}
 0x3d5   : > { %s1240_s7 = smov 128   ;;  %s1241_s10 = smov 8  }
 0x3d6   : > { %888 = dma.vmem_to_hbm [thread:$0]  (%p1676_p5), %s1577_s6, 256, %s1583_s28, %s625_s1, %s1240_s7, %s1240_s7, %s1241_s10  }
 0x3d7 PF: > { %s1677_s23 = sld [smem:[#allocation23_spill]]  ;;  %p908_p12 = scmp.ge.s32.totalorder %s1225_s22, 2 }
 0x3d8   : > { %s657_s30 = sand.u32 1, %s1197_s15  }
 0x3d9   : > { %s658_s25 = scalar_lea.sflag [#allocation7], %s657_s30 }
 0x3dd   : > { %p1678_p10 = scmp.ne.s32.totalorder %s1677_s23, 0 }
 0x3df   : > { %p904_p4 = pnand %p908_p12, %p1678_p10 }
 0x3e1   : > { %1192 = dma.done.wait (!%p904_p4), %s658_s25, 256  }
 0x3e2   : > { %1194 = vsyncadd (!%p904_p4), %s658_s25, 4294967040  ;;  %s26_s22 = sadd.s32 1, %s1225_s22   ;;  %s1679_s24 = sld [smem:[#allocation18_spill]] }
 0x3e3   : > { %p23_p6 = scmp.ge.s32.totalorder %s26_s22, 10   ;;  %s1680_s17 = sld [smem:[#allocation24_spill]] }
 0x3e4   : > { %s1681_s18 = sld [smem:[#allocation19_spill]]  ;;  %s1682_s19 = sld [smem:[#allocation20_spill]] }
 0x3e5   : > { %s1683_s20 = sld [smem:[#allocation21_spill]]  ;;  %s1684_s21 = sld [smem:[#allocation22_spill]] }
 0x3e6   : > { %s1685_s15 = smov %s1201_s16  ;;  %25 = sbr.rel (!%p23_p6) target bundleno = 13 (0xd), region = 126 }
 0x3e8   : > { %s1686_s16 = smov %s1679_s24 }
 0x3ed   :  { %663 = vsyncpa [#allocation6], 1 }
 0x3ee   :  { %665 = vsyncpa [#allocation6 + $0x1], 1 }
 0x3ef   :  { %666 = vsyncpa [#allocation9], 1 }
 0x3f0   :  { %668 = vsyncpa [#allocation9 + $0x1], 1 }
 0x3f1   :  { %669 = vsyncpa [#allocation12], 1 }
 0x3f2   :  { %671 = vsyncpa [#allocation12 + $0x1], 1 }
 0x3f3   :  { %672 = vsyncpa [#allocation7], 1 }
 0x3f4   :  { %674 = vsyncpa [#allocation7 + $0x1], 1 }

</bundles_post_ra>
